<compile_context>
chip_gen: v7x
topology: tpu7x:2x2x1
jax: 0.10.0
libtpu: 0.0.40
codegen_flags: <defaults>
</compile_context>

<pallas_src>
import functools

import jax
import jax.numpy as jnp
from jax.experimental import pallas as pl
from jax.experimental.pallas import tpu as pltpu

LANE = 128    # TPU vreg lane width (fc2 weights are lane-padded to this inside VMEM)
IN_DIM = 64   # GlimpseNetwork input / hidden width (fixed by the module)


def _round_up(n, m):
    return ((n + m - 1) // m) * m


def _glimpse_kernel(x_ref, w1_ref, b1_ref, w2_ref, b2_ref, o_ref, *, nb_actions):
    # fc1: [TB,64](bf16) @ [64,64](bf16) -> f32 accumulate; bias + leaky_relu(0.2) in f32
    h = jnp.dot(x_ref[...], w1_ref[...], preferred_element_type=jnp.float32)
    h = h + b1_ref[...]
    h = jnp.where(h > 0, h, 0.2 * h)
    # fc2: [TB,64](bf16) @ [64,128](bf16, zero lane-padded) -> f32; bias + tanh in f32
    y = jnp.dot(h.astype(w2_ref.dtype), w2_ref[...],
                preferred_element_type=jnp.float32)
    y = jnp.tanh(y + b2_ref[...])
    # Compact store: only the real action lanes go to the (TB, nb_actions) output block.
    o_ref[...] = y[:, :nb_actions].astype(o_ref.dtype)


def glimpse_network(x, w1, b1, w2, b2, *, tb=4096):
    """Forward pass of GlimpseNetwork.

    x : [B, 64]            (any float dtype; cast to bf16 for the MXU)
    w1: [64, 64]  b1: [1, 64]
    w2: [64, nb_actions]   b2: [1, nb_actions]   (COMPACT -- true action count)
    Returns [B, nb_actions] float32.
    """
    B = x.shape[0]
    nb_actions = w2.shape[1]

    # --- lane-pad fc2 weights/bias for a lane-clean matmul (resident in VMEM, one load) ---
    a_pad = _round_up(max(nb_actions, LANE), LANE)
    if nb_actions != a_pad:
        w2p = jnp.pad(w2, ((0, 0), (0, a_pad - nb_actions)))
        b2p = jnp.pad(b2, ((0, 0), (0, a_pad - nb_actions)))
    else:
        w2p, b2p = w2, b2

    # --- bf16 matmul operands, f32 biases (no-ops if the params are already so) ---
    x = x.astype(jnp.bfloat16)
    w1 = w1.astype(jnp.bfloat16)
    w2p = w2p.astype(jnp.bfloat16)
    b1 = b1.astype(jnp.float32)
    b2p = b2p.astype(jnp.float32)

    # --- batch tiling: multiple of 16 (bf16 sublane packing); weights stay resident ---
    tb = min(tb, _round_up(B, 16))
    tb = _round_up(tb, 16)
    b_pad = _round_up(B, tb)
    if b_pad != B:
        x = jnp.pad(x, ((0, b_pad - B), (0, 0)))
    grid = (b_pad // tb,)

    # --- scoped-VMEM budget: double-buffered x & out tiles + f32 temps + resident params ---
    vmem_est = (2 * tb * IN_DIM * 2            # x tile, bf16, double-buffered
                + 2 * tb * LANE * 4            # out tile (lane-padded VMEM layout), f32
                + tb * IN_DIM * 4              # h intermediate, f32
                + tb * LANE * 4                # y intermediate, f32
                + (IN_DIM * IN_DIM + IN_DIM * a_pad) * 2   # w1, w2 (bf16)
                + (IN_DIM + a_pad) * 4)                    # b1, b2 (f32)
    vmem_limit = min(64 * 1024 * 1024, max(16 * 1024 * 1024, 2 * vmem_est))

    flops = 2 * b_pad * IN_DIM * (IN_DIM + a_pad)
    bytes_accessed = (x.size * 2 + w1.size * 2 + w2p.size * 2
                      + b1.size * 4 + b2p.size * 4 + b_pad * nb_actions * 4)

    kernel = functools.partial(_glimpse_kernel, nb_actions=nb_actions)

    out = pl.pallas_call(
        kernel,
        out_shape=jax.ShapeDtypeStruct((b_pad, nb_actions), jnp.float32),
        grid=grid,
        in_specs=[
            pl.BlockSpec((tb, IN_DIM), lambda i: (i, 0)),       # x: batch-tiled
            pl.BlockSpec((IN_DIM, IN_DIM), lambda i: (0, 0)),   # w1: resident
            pl.BlockSpec((1, IN_DIM), lambda i: (0, 0)),        # b1: resident
            pl.BlockSpec((IN_DIM, a_pad), lambda i: (0, 0)),    # w2 (lane-padded): resident
            pl.BlockSpec((1, a_pad), lambda i: (0, 0)),         # b2 (lane-padded): resident
        ],
        # Compact output block: last dim == full array dim, so (8,128) rule is satisfied.
        out_specs=pl.BlockSpec((tb, nb_actions), lambda i: (i, 0)),
        compiler_params=pltpu.CompilerParams(
            dimension_semantics=("parallel",),                  # shards batch over v7x's 2 TCs
            vmem_limit_bytes=vmem_limit),
        cost_estimate=pl.CostEstimate(
            flops=flops,
            transcendentals=b_pad * a_pad,
            bytes_accessed=bytes_accessed),
    )(x, w1, b1, w2p, b2p)

    # Only padded batch rows are dropped (lanes are already compact); no-op when B % tb == 0.
    return out[:B] if b_pad != B else out


def init_params(key, nb_actions):
    """nn.Linear-style init (uniform(-1/sqrt(fan_in), 1/sqrt(fan_in))), stored as [in, out].

    Weights are kept COMPACT (true nb_actions) in bf16; biases in f32.  The wrapper does the
    lane padding internally, so the true action count never gets lost in padded parameters.
    """
    k1, k2, k3, k4 = jax.random.split(key, 4)
    bound = 1.0 / jnp.sqrt(64.0)
    w1 = jax.random.uniform(k1, (IN_DIM, IN_DIM), jnp.float32, -bound, bound)
    b1 = jax.random.uniform(k2, (1, IN_DIM), jnp.float32, -bound, bound)
    w2 = jax.random.uniform(k3, (IN_DIM, nb_actions), jnp.float32, -bound, bound)
    b2 = jax.random.uniform(k4, (1, nb_actions), jnp.float32, -bound, bound)
    return w1.astype(jnp.bfloat16), b1, w2.astype(jnp.bfloat16), b2


def glimpse_network_ref(x, w1, b1, w2, b2):
    """Pure-JAX reference (f32 math on the same weight values)."""
    h = x @ w1.astype(jnp.float32) + b1
    h = jnp.where(h > 0, h, 0.2 * h)
    return jnp.tanh(h @ w2.astype(jnp.float32) + b2)


if __name__ == "__main__":
    key = jax.random.PRNGKey(0)
    k_params, k_x = jax.random.split(key)

    nb_actions = 4
    batch = 8

    w1, b1, w2, b2 = init_params(k_params, nb_actions)
    x = jax.random.normal(k_x, (batch, IN_DIM), jnp.float32)

    out = glimpse_network(x, w1, b1, w2, b2)
    out = jax.block_until_ready(out)

    ref = glimpse_network_ref(x, w1, b1, w2, b2)
    assert out.shape == (batch, nb_actions), out.shape
    # bf16 matmul operands with f32 accumulation -> loosened tolerance on post-tanh values
    assert jnp.allclose(out, ref, atol=2e-2, rtol=2e-2), float(jnp.max(jnp.abs(out - ref)))

    print("KERNEL_OK")
</pallas_src>

<mosaic_0001>
module attributes {stable_mosaic.version = 11 : i64} {
  func.func @_glimpse_kernel(%arg0: i32, %arg1: memref<16x64xbf16, #tpu.memory_space<vmem>>, %arg2: memref<64x64xbf16, #tpu.memory_space<vmem>>, %arg3: memref<1x64xf32, #tpu.memory_space<vmem>>, %arg4: memref<64x128xbf16, #tpu.memory_space<vmem>>, %arg5: memref<1x128xf32, #tpu.memory_space<vmem>>, %arg6: memref<16x4xf32, #tpu.memory_space<vmem>>) attributes {dimension_semantics = [#tpu.dimension_semantics<parallel>], iteration_bounds = array<i64: 1>, scalar_prefetch = 0 : i64, scratch_operands = 0 : i64, tpu.core_type = #tpu.core_type<tc>, window_params = [{transform_indices = @transform_0, window_bounds = array<i64: 16, 64>}, {pipeline_mode = #tpu.pipeline_mode<synchronous>, transform_indices = @transform_1, window_bounds = array<i64: 64, 64>}, {pipeline_mode = #tpu.pipeline_mode<synchronous>, transform_indices = @transform_2, window_bounds = array<i64: 1, 64>}, {pipeline_mode = #tpu.pipeline_mode<synchronous>, transform_indices = @transform_3, window_bounds = array<i64: 64, 128>}, {pipeline_mode = #tpu.pipeline_mode<synchronous>, transform_indices = @transform_4, window_bounds = array<i64: 1, 128>}, {transform_indices = @transform_5, window_bounds = array<i64: 16, 4>}]} {
    %c0 = arith.constant 0 : index
    %c0_0 = arith.constant 0 : index
    %0 = vector.load %arg1[%c0, %c0_0] : memref<16x64xbf16, #tpu.memory_space<vmem>>, vector<16x64xbf16>
    %c0_1 = arith.constant 0 : index
    %c0_2 = arith.constant 0 : index
    %1 = vector.load %arg2[%c0_1, %c0_2] : memref<64x64xbf16, #tpu.memory_space<vmem>>, vector<64x64xbf16>
    %cst = arith.constant dense<0.000000e+00> : vector<16x64xf32>
    %2 = tpu.matmul %0, %1, %cst {dimension_numbers = #tpu.dot_dimension_numbers<[1], [0], [0], [1], [0, 0, 1, 1], [], []>} : vector<16x64xbf16>, vector<64x64xbf16>, vector<16x64xf32> -> vector<16x64xf32>
    %c0_3 = arith.constant 0 : index
    %c0_4 = arith.constant 0 : index
    %3 = vector.load %arg3[%c0_3, %c0_4] : memref<1x64xf32, #tpu.memory_space<vmem>>, vector<1x64xf32>
    %4 = vector.broadcast %3 : vector<1x64xf32> to vector<16x64xf32>
    %5 = arith.addf %2, %4 : vector<16x64xf32>
    %cst_5 = arith.constant 0.000000e+00 : f32
    %6 = vector.broadcast %cst_5 : f32 to vector<16x64xf32>
    %7 = arith.cmpf ogt, %5, %6 : vector<16x64xf32>
    %cst_6 = arith.constant 2.000000e-01 : f32
    %8 = vector.broadcast %cst_6 : f32 to vector<16x64xf32>
    %9 = arith.mulf %8, %5 : vector<16x64xf32>
    %10 = arith.select %7, %5, %9 : vector<16x64xi1>, vector<16x64xf32>
    %11 = arith.truncf %10 : vector<16x64xf32> to vector<16x64xbf16>
    %c0_7 = arith.constant 0 : index
    %c0_8 = arith.constant 0 : index
    %12 = vector.load %arg4[%c0_7, %c0_8] : memref<64x128xbf16, #tpu.memory_space<vmem>>, vector<64x128xbf16>
    %cst_9 = arith.constant dense<0.000000e+00> : vector<16x128xf32>
    %13 = tpu.matmul %11, %12, %cst_9 {dimension_numbers = #tpu.dot_dimension_numbers<[1], [0], [0], [1], [0, 0, 1, 1], [], []>} : vector<16x64xbf16>, vector<64x128xbf16>, vector<16x128xf32> -> vector<16x128xf32>
    %c0_10 = arith.constant 0 : index
    %c0_11 = arith.constant 0 : index
    %14 = vector.load %arg5[%c0_10, %c0_11] : memref<1x128xf32, #tpu.memory_space<vmem>>, vector<1x128xf32>
    %15 = vector.broadcast %14 : vector<1x128xf32> to vector<16x128xf32>
    %16 = arith.addf %13, %15 : vector<16x128xf32>
    %17 = math.tanh %16 : vector<16x128xf32>
    %18 = vector.extract_strided_slice %17 {offsets = [0, 0], sizes = [16, 4], strides = [1, 1]} : vector<16x128xf32> to vector<16x4xf32>
    %c0_12 = arith.constant 0 : index
    %c0_13 = arith.constant 0 : index
    %19 = vector.load %arg6[%c0_12, %c0_13] : memref<16x4xf32, #tpu.memory_space<vmem>>, vector<16x4xf32>
    tpu.vector_store %arg6[%c0_12, %c0_13], %18 {strides = array<i32>} : memref<16x4xf32, #tpu.memory_space<vmem>>, vector<16x4xf32>,
    return
  }
  func.func @transform_0(%arg0: i32) -> (i32, i32) {
    %c0_i32 = arith.constant 0 : i32
    %c0_i32_0 = arith.constant 0 : i32
    return %arg0, %c0_i32 : i32, i32
  }
  func.func @transform_1(%arg0: i32) -> (i32, i32) {
    %c0_i32 = arith.constant 0 : i32
    %c0_i32_0 = arith.constant 0 : i32
    %c0_i32_1 = arith.constant 0 : i32
    return %c0_i32, %c0_i32_0 : i32, i32
  }
  func.func @transform_2(%arg0: i32) -> (i32, i32) {
    %c0_i32 = arith.constant 0 : i32
    %c0_i32_0 = arith.constant 0 : i32
    %c0_i32_1 = arith.constant 0 : i32
    return %c0_i32, %c0_i32_0 : i32, i32
  }
  func.func @transform_3(%arg0: i32) -> (i32, i32) {
    %c0_i32 = arith.constant 0 : i32
    %c0_i32_0 = arith.constant 0 : i32
    %c0_i32_1 = arith.constant 0 : i32
    return %c0_i32, %c0_i32_0 : i32, i32
  }
  func.func @transform_4(%arg0: i32) -> (i32, i32) {
    %c0_i32 = arith.constant 0 : i32
    %c0_i32_0 = arith.constant 0 : i32
    %c0_i32_1 = arith.constant 0 : i32
    return %c0_i32, %c0_i32_0 : i32, i32
  }
  func.func @transform_5(%arg0: i32) -> (i32, i32) {
    %c0_i32 = arith.constant 0 : i32
    %c0_i32_0 = arith.constant 0 : i32
    return %arg0, %c0_i32 : i32, i32
  }
}

</mosaic_0001>

<bundles_post_ra>
// kernel: tpu_custom_call.1
= control target key start
LH: loop header
LB: loop body
LE: loop exit
PB: predicated region body
PF: predicated region fallthrough
CT: control target
= control target key end

     0   :  { %10 = vsyncpa [#allocation3], 0  ;;  %s494_s0 = inlined_call_operand.hbm [shape: bf16[16,64], index: 0, kind: input, shape index: {}]   ;;  %s495_s1 = inlined_call_operand.hbm [shape: bf16[64,64], index: 1, kind: input, shape index: {}]   ;;  %s496_s2 = inlined_call_operand.vmem [shape: f32[1,64], index: 2, kind: input, shape index: {}]   ;;  %s497_s3 = inlined_call_operand.hbm [shape: bf16[64,128], index: 3, kind: input, shape index: {}]   ;;  %s498_s4 = inlined_call_operand.vmem [shape: f32[1,128], index: 4, kind: input, shape index: {}]   ;;  %s499_s5 = inlined_call_operand.vmem [shape: f32[16,4], index: 5, kind: output, shape index: {}]  }
   0x1   :  { %11 = vsyncpa [#allocation5], 0  ;;  %s391_s18 = smov [#allocation4]   ;;  %s392_s20 = smov [#allocation2]  }
   0x2   :  { %s29_s19 = sshll.u32 %s391_s18, 4  ;;  %s17_s21 = sshll.u32 %s392_s20, 4  ;;  %s30_s19 = int_to_ptr.vmem [resolvable:$true] %s29_s19  ;;  %s428_s21 = int_to_ptr.vmem [resolvable:$true] %s17_s21 }
   0x3   :  { %s321_s24 = scalar_lea.hbm %s495_s1, 512 }
   0x4   :  { %p322_p0 = scmp.ne.s32.totalorder %s495_s1, %s321_s24  ;;  %p325_p1 = scmp.lt.u32.totalorder %s321_s24, %s495_s1 }
   0x6   :  { %p327_p2 = pnand %p325_p1, %p322_p0 }
   0x8   :  { %330 = shalt.err (!%p327_p2)
}
   0x9   :  { %s331_s29 = scalar_lea.vmem %s30_s19, 512  ;;  %p336_p4 = scmp.lt.s32.totalorder %s30_s19, %s30_s19 }
   0xa   :  { %p332_p3 = scmp.ne.s32.totalorder %s30_s19, %s331_s29  ;;  %p337_p5 = scmp.lt.s32.totalorder %s331_s29, %s331_s29 }
   0xc   :  { %p338_p6 = por %p337_p5, %p336_p4 }
   0xe   :  { %p339_p7 = pnand %p338_p6, %p332_p3 }
  0x10   :  { %342 = shalt.err (!%p339_p7)
}
  0x11   :  { %s393_s30 = smov 64   ;;  %s394_s6 = smov 4  }
  0x12   :  { %35 = dma.hbm_to_vmem [thread:$0]  %s495_s1, 512, %s30_s19, [#allocation5], %s393_s30, %s393_s30, %s394_s6  }
  0x13   :  { %s343_s11 = scalar_lea.hbm %s494_s0, 128 }
  0x14   :  { %p344_p8 = scmp.ne.s32.totalorder %s494_s0, %s343_s11  ;;  %p347_p9 = scmp.lt.u32.totalorder %s343_s11, %s494_s0 }
  0x16   :  { %p349_p10 = pnand %p347_p9, %p344_p8 }
  0x18   :  { %352 = shalt.err (!%p349_p10)
}
  0x19   :  { %s353_s16 = scalar_lea.vmem %s428_s21, 128  ;;  %p358_p12 = scmp.lt.s32.totalorder %s428_s21, %s428_s21 }
  0x1a   :  { %p354_p11 = scmp.ne.s32.totalorder %s428_s21, %s353_s16  ;;  %p359_p13 = scmp.lt.s32.totalorder %s353_s16, %s353_s16 }
  0x1c   :  { %p360_p0 = por %p359_p13, %p358_p12 }
  0x1e   :  { %p361_p1 = pnand %p360_p0, %p354_p11 }
  0x20   :  { %364 = shalt.err (!%p361_p1)
}
  0x21   :  { %23 = dma.hbm_to_vmem [thread:$0]  %s494_s0, 128, %s428_s21, [#allocation3], %s393_s30, %s393_s30, %s394_s6  }
  0x22   :  { %s395_s18 = smov [#allocation6]   ;;  %s365_s23 = scalar_lea.hbm %s497_s3, 512 }
  0x23   :  { %s43_s19 = sshll.u32 %s395_s18, 4  ;;  %p366_p2 = scmp.ne.s32.totalorder %s497_s3, %s365_s23  ;;  %s44_s19 = int_to_ptr.vmem [resolvable:$true] %s43_s19 }
  0x24   :  { %p369_p3 = scmp.lt.u32.totalorder %s365_s23, %s497_s3 }
  0x26   :  { %p371_p4 = pnand %p369_p3, %p366_p2 }
  0x28   :  { %374 = shalt.err (!%p371_p4)
}
  0x29   :  { %s375_s28 = scalar_lea.vmem %s44_s19, 512  ;;  %p380_p6 = scmp.lt.s32.totalorder %s44_s19, %s44_s19 }
  0x2a   :  { %p376_p5 = scmp.ne.s32.totalorder %s44_s19, %s375_s28  ;;  %p381_p7 = scmp.lt.s32.totalorder %s375_s28, %s375_s28 }
  0x2c   :  { %p382_p8 = por %p381_p7, %p380_p6 }
  0x2e   :  { %p383_p9 = pnand %p382_p8, %p376_p5 }
  0x30   :  { %386 = shalt.err (!%p383_p9)
}
  0x31   :  { %49 = dma.hbm_to_vmem [thread:$0]  %s497_s3, 512, %s44_s19, [#allocation5], %s393_s30, %s393_s30, %s394_s6  }
  0x32   :  { %387 = dma.done.wait [#allocation3], 128  }
  0x33   :  { %388 = vsyncadd [#allocation3], 4294967168 }
  0x34   :  { %389 = dma.done.wait [#allocation5], 1024  }
  0x35   :  { %390 = vsyncadd [#allocation5], 4294966272  ;;  %v396_v0 = vmov 0.0   ;;  %vm397_vm0 = vmmov 0   ;;  %v308_v1 = vld [vmem:[#allocation4] sm:$0xff]   ;;  %v309_v2 = vld [vmem:[#allocation4 + $0x8] sm:$0xff]  }
  0x36   :  { %277 = vmatprep.subr.bf16.mxu0 %v396_v0  ;;  %285 = vmatprep.mubr.msk.bf16.mxu0 %vm397_vm0, %v396_v0  ;;  %v313_v3 = vld [vmem:[#allocation6] sm:$0xff]   ;;  %v310_v4 = vld [vmem:[#allocation4 + $0x10] sm:$0xff]   ;;  %v314_v5 = vld [vmem:[#allocation6 + $0x8] sm:$0xff]   ;;  %vm108_vm1 = vcmask 523264   ;;  %vm245_vm4 = vcmask 31744  }
  0x37   :  { %289 = vmatprep.subr.bf16.mxu1 %v396_v0  ;;  %297 = vmatprep.mubr.msk.bf16.mxu1 %vm397_vm0, %v396_v0  ;;  %v311_v6 = vld [vmem:[#allocation4 + $0x18] sm:$0xff]   ;;  %v315_v8 = vld [vmem:[#allocation6 + $0x10] sm:$0xff]  }
  0x38   :  { %278 = vmatpush3.bf16.msra.mxu0 %v308_v1  ;;  %290 = vmatpush3.bf16.msra.mxu1 %v313_v3  ;;  %v312_v7 = vld [vmem:[#allocation2] sm:$0xff]  }
  0x39   :  { %279 = vmatprep.subr.bf16.mxu0 %v396_v0  ;;  %291 = vmatprep.subr.bf16.mxu1 %v396_v0  ;;  %v316_v9 = vld [vmem:[#allocation6 + $0x18] sm:$0xff]  }
  0x3a   :  { %v254_v10 = vld [vmem:[%s496_s2] ss:$0 sm:$0xff] }
  0x3b   :  { %v261_v22 = vld [vmem:[%s498_s4] ss:$0 sm:$0xff] }
  0x3c   :  { %280 = vmatpush3.bf16.msra.mxu0 %v309_v2  ;;  %292 = vmatpush3.bf16.msra.mxu1 %v314_v5 }
  0x3d   :  { %281 = vmatprep.subr.bf16.mxu0 %v396_v0  ;;  %293 = vmatprep.subr.bf16.mxu1 %v396_v0 }
  0x40   :  { %282 = vmatpush3.bf16.msra.mxu0 %v310_v4  ;;  %294 = vmatpush3.bf16.msra.mxu1 %v315_v8 }
  0x41   :  { %283 = vmatprep.subr.bf16.mxu0 %v396_v0  ;;  %295 = vmatprep.subr.bf16.mxu1 %v396_v0 }
  0x44   :  { %284 = vmatpush3.bf16.msra.mxu0 %v311_v6  ;;  %296 = vmatpush3.bf16.msra.mxu1 %v316_v9 }
  0x47   :  { %286 = vmatmul.mubr.msk.bf16.vlgmr.msra.gmra.mrb[0].mxu0 %vm108_vm1, %v312_v7 }
 0x11a   :  { %v146_v11 = vpop.f32.mrb[0].mxu0 }
 0x11b   :  { %v147_v12 = vadd.f32 %v254_v10, %v146_v11  ;;  %v287_v13 = vpop.f32.mrb[1].mxu0 }
 0x11c   :  { %v149_v14 = vpop.f32.mrb[2].mxu0 }
 0x11d   :  { %v155_v15 = vmul.f32 0.2, %v147_v12  ;;  %v150_v16 = vadd.f32 %v254_v10, %v149_v14  ;;  %v288_v17 = vpop.f32.mrb[3].mxu0  ;;  %vm153_vm2 = vcmp.gt.f32.partialorder %v147_v12, 0.0 }
 0x11f   :  { %vm154_vm3 = vcmp.gt.f32.partialorder %v150_v16, 0.0  ;;  %v156_v18 = vmul.f32 0.2, %v150_v16  ;;  %v157_v19 = vsel %vm153_vm2, %v147_v12, %v155_v15 }
 0x121   :  { %v158_v20 = vsel %vm154_vm3, %v150_v16, %v156_v18 }
 0x122   :  { %v159_v21 = vpack.c.bf16 %v158_v20, %v157_v19 }
 0x124   :  { %298 = vmatmul.mubr.msk.bf16.vlgmr.msra.gmra.mrb[0].mxu1 %vm108_vm1, %v159_v21 }
 0x1f7   :  { %v236_v23 = vpop.f32.mrb[0].mxu1 }
 0x1f8   :  { %v237_v24 = vadd.f32 %v261_v22, %v236_v23  ;;  %v299_v25 = vpop.f32.mrb[1].mxu1 }
 0x1f9   :  { %v239_v26 = vpop.f32.mrb[2].mxu1 }
 0x1fa   :  { %317 = vtanh.f32 %v237_v24  ;;  %v240_v27 = vadd.f32 %v261_v22, %v239_v26  ;;  %v300_v28 = vpop.f32.mrb[3].mxu1 }
 0x1fc   :  { %319 = vtanh.f32 %v240_v27 }
 0x204   :  { %v318_v29 = vpop.eup %317 }
 0x205   :  { %246 = vst.msk [vmem:[%s499_s5] sm:$0xff] %vm245_vm4, %v318_v29 }
 0x206   :  { %v320_v30 = vpop.eup %319 }
 0x207   :  { %247 = vst.msk [vmem:[%s499_s5 + $0x8] sm:$0xff] %vm245_vm4, %v320_v30 }
 0x208   :  { %252 = vsyncpa [#allocation3], 1 }
 0x209   :  { %253 = vsyncpa [#allocation5], 1 }

</bundles_post_ra>
